<compile_context>
chip_gen: v7x
topology: tpu7x:2x2x1
jax: 0.10.0
libtpu: 0.0.40
codegen_flags: <defaults>
</compile_context>

<pallas_src>
import functools

import jax
import jax.numpy as jnp
from jax.experimental import pallas as pl
from jax.experimental.pallas import tpu as pltpu


def _round_up(x, m):
    return (x + m - 1) // m * m


def _vmem_capacity_bytes():
    try:
        return int(pltpu.get_tpu_info().vmem_capacity_bytes)
    except Exception:
        # Conservative default that is safe on every generation (v7x = 64 MiB).
        return 64 * 1024 * 1024


# ----------------------------------------------------------------------------
# Kernels
# ----------------------------------------------------------------------------
def _fused_kernel(x_ref, w_ref, b_ref, res_ref, g_ref, be_ref, o_ref,
                  *, eps, inv_h):
    """Single-K path: resident W, one MXU dot + fused bias/residual/LayerNorm."""
    acc = jnp.dot(x_ref[...], w_ref[...], preferred_element_type=jnp.float32)
    y = acc + b_ref[...] + res_ref[...].astype(jnp.float32)
    # Two independent cross-lane reductions (no serial dependency).
    s1 = jnp.sum(y, axis=-1, keepdims=True)
    s2 = jnp.sum(y * y, axis=-1, keepdims=True)
    mean = s1 * inv_h
    var = jnp.maximum(s2 * inv_h - mean * mean, 0.0)
    inv = jax.lax.rsqrt(var + eps)
    o_ref[...] = ((y - mean) * inv * g_ref[...] + be_ref[...]).astype(o_ref.dtype)


def _ktiled_kernel(x_ref, w_ref, b_ref, res_ref, g_ref, be_ref, o_ref, acc_ref,
                   *, eps, inv_h):
    """Fallback path: K-tiled reduction with an f32 VMEM accumulator."""
    k = pl.program_id(1)
    partial = jnp.dot(x_ref[...], w_ref[...], preferred_element_type=jnp.float32)

    @pl.when(k == 0)
    def _():
        acc_ref[...] = partial          # '=' on first step: no zero-init store

    @pl.when(k != 0)
    def _():
        acc_ref[...] += partial

    @pl.when(k == pl.num_programs(1) - 1)
    def _():
        y = acc_ref[...] + b_ref[...] + res_ref[...].astype(jnp.float32)
        s1 = jnp.sum(y, axis=-1, keepdims=True)
        s2 = jnp.sum(y * y, axis=-1, keepdims=True)
        mean = s1 * inv_h
        var = jnp.maximum(s2 * inv_h - mean * mean, 0.0)
        inv = jax.lax.rsqrt(var + eps)
        o_ref[...] = ((y - mean) * inv * g_ref[...] + be_ref[...]).astype(o_ref.dtype)


# ----------------------------------------------------------------------------
# Wrapper
# ----------------------------------------------------------------------------
def trans_out(hidden_states, input_tensor, weight, bias, gamma, beta,
              *, eps=1e-10):
    """hidden_states: (B, S, I); input_tensor: (B, S, H).
    weight: (I, H)  -- transpose of PyTorch nn.Linear.weight (H, I).
    bias, gamma, beta: (H,).  Returns (B, S, H)."""
    B, S, I = hidden_states.shape
    H = input_tensor.shape[-1]
    assert weight.shape == (I, H), (
        f"weight must be pre-transposed to (intermediate, hidden)=({I},{H}); "
        f"got {weight.shape}")
    assert bias.shape == (H,) and gamma.shape == (H,) and beta.shape == (H,)
    M = B * S

    x2d = hidden_states.reshape(M, I)
    res2d = input_tensor.reshape(M, H)
    b2d = bias.reshape(1, H)
    g2d = gamma.reshape(1, H)
    be2d = beta.reshape(1, H)

    xsz = jnp.dtype(hidden_states.dtype).itemsize
    wsz = jnp.dtype(weight.dtype).itemsize
    rsz = jnp.dtype(input_tensor.dtype).itemsize
    osz = xsz

    vmem_cap = _vmem_capacity_bytes()
    budget = int(vmem_cap * 0.80)       # leave headroom for Mosaic scratch/sems
    m_ceil = _round_up(max(M, 1), 8)

    out_shape = jax.ShapeDtypeStruct((M, H), hidden_states.dtype)
    kernel_args = (x2d, weight, b2d, res2d, g2d, be2d)

    # --- primary path: fully resident W, no K axis ---------------------------
    def fused_bytes(tm):
        # conservative: count everything as double-buffered
        return (2 * tm * I * xsz          # x tile
                + 2 * I * H * wsz         # resident W
                + 2 * tm * H * rsz        # residual tile
                + 2 * tm * H * osz        # output tile
                + 2 * 3 * H * 4           # bias / gamma / beta
                + tm * H * 4)             # f32 dot result headroom

    tm = None
    for cand in (1024, 512, 256, 128, 64, 32, 16, 8):
        c = min(cand, m_ceil)
        if fused_bytes(c) <= budget:
            tm = c
            break

    if tm is not None:
        # v7x megacore: make sure the "parallel" M axis feeds both TensorCores.
        if pl.cdiv(M, tm) == 1 and m_ceil >= 16:
            tm = _round_up(pl.cdiv(m_ceil, 2), 8)
        num_m = pl.cdiv(M, tm)
        vmem_limit = min(max(int(fused_bytes(tm) * 1.25), 32 * 1024 * 1024), budget)

        kernel = functools.partial(_fused_kernel, eps=float(eps), inv_h=1.0 / H)
        out2d = pl.pallas_call(
            kernel,
            out_shape=out_shape,
            grid=(num_m,),
            in_specs=[
                pl.BlockSpec((tm, I), lambda i: (i, 0)),   # x (streamed over M)
                pl.BlockSpec((I, H), lambda i: (0, 0)),    # W resident (1 HBM read)
                pl.BlockSpec((1, H), lambda i: (0, 0)),    # bias   (resident)
                pl.BlockSpec((tm, H), lambda i: (i, 0)),   # residual
                pl.BlockSpec((1, H), lambda i: (0, 0)),    # gamma  (resident)
                pl.BlockSpec((1, H), lambda i: (0, 0)),    # beta   (resident)
            ],
            out_specs=pl.BlockSpec((tm, H), lambda i: (i, 0)),
            compiler_params=pltpu.CompilerParams(
                dimension_semantics=("parallel",),
                vmem_limit_bytes=vmem_limit),
        )(*kernel_args)
        return out2d.reshape(B, S, H)

    # --- fallback path: W too large for resident VMEM -> K-tiled -------------
    if I % 512 == 0:
        tk = 512
    elif I % 256 == 0:
        tk = 256
    elif I % 128 == 0:
        tk = 128
    else:
        tk = I  # TODO(synk): ragged I would need in-kernel K padding/masking.

    def ktiled_bytes(tm_):
        return (2 * tm_ * tk * xsz + 2 * tk * H * wsz + 2 * tm_ * H * rsz
                + 2 * tm_ * H * osz + 2 * 3 * H * 4 + tm_ * H * 4)

    tm = 8
    for cand in (1024, 512, 256, 128, 64, 32, 16, 8):
        c = min(cand, m_ceil)
        if ktiled_bytes(c) <= budget:
            tm = c
            break
    if pl.cdiv(M, tm) == 1 and m_ceil >= 16:
        tm = _round_up(pl.cdiv(m_ceil, 2), 8)
    num_m = pl.cdiv(M, tm)
    num_k = pl.cdiv(I, tk)
    vmem_limit = min(max(int(ktiled_bytes(tm) * 1.25), 32 * 1024 * 1024), budget)

    kernel = functools.partial(_ktiled_kernel, eps=float(eps), inv_h=1.0 / H)
    out2d = pl.pallas_call(
        kernel,
        out_shape=out_shape,
        grid=(num_m, num_k),
        in_specs=[
            pl.BlockSpec((tm, tk), lambda i, k: (i, k)),   # x tile
            pl.BlockSpec((tk, H), lambda i, k: (k, 0)),    # W tile
            pl.BlockSpec((1, H), lambda i, k: (0, 0)),     # bias   (resident)
            pl.BlockSpec((tm, H), lambda i, k: (i, 0)),    # residual
            pl.BlockSpec((1, H), lambda i, k: (0, 0)),     # gamma  (resident)
            pl.BlockSpec((1, H), lambda i, k: (0, 0)),     # beta   (resident)
        ],
        out_specs=pl.BlockSpec((tm, H), lambda i, k: (i, 0)),
        scratch_shapes=[pltpu.VMEM((tm, H), jnp.float32)],
        compiler_params=pltpu.CompilerParams(
            dimension_semantics=("parallel", "arbitrary"),
            vmem_limit_bytes=vmem_limit),
    )(*kernel_args)
    return out2d.reshape(B, S, H)


# TODO(synk): for very small hidden sizes (e.g. H=32) output stores are
# lane-masked (< 128 lanes); realistic hidden sizes (>=768) are lane-dense.

if __name__ == "__main__":
    # Config: intermediate_size=64, hidden_size=32
    B, S, I, H = 2, 8, 64, 32
    eps = 1e-10

    key = jax.random.PRNGKey(0)
    k_hs, k_res, k_w, k_b = jax.random.split(key, 4)

    hidden_states = jax.random.normal(k_hs, (B, S, I), dtype=jnp.float32)
    input_tensor = jax.random.normal(k_res, (B, S, H), dtype=jnp.float32)

    # Deterministic synthetic parameters (nn.Linear / nn.LayerNorm shapes).
    weight = jax.random.normal(k_w, (I, H), dtype=jnp.float32) * 0.02  # [I, H]
    bias = jax.random.normal(k_b, (H,), dtype=jnp.float32) * 0.02
    gamma = jnp.ones((H,), dtype=jnp.float32)   # LayerNorm.weight
    beta = jnp.zeros((H,), dtype=jnp.float32)   # LayerNorm.bias

    out = trans_out(hidden_states, input_tensor, weight, bias, gamma, beta,
                    eps=eps)
    out = jax.block_until_ready(out)

    # Pure-JAX reference check (dropout p=0 is identity).
    ref_h = hidden_states @ weight + bias
    ref_y = ref_h + input_tensor
    mu = ref_y.mean(-1, keepdims=True)
    var = ((ref_y - mu) ** 2).mean(-1, keepdims=True)
    ref = (ref_y - mu) / jnp.sqrt(var + eps) * gamma + beta
    assert out.shape == (B, S, H)
    assert jnp.allclose(out, ref, atol=1e-5, rtol=1e-5)

    print("KERNEL_OK")
</pallas_src>

<mosaic_0001>
module attributes {stable_mosaic.version = 11 : i64} {
  func.func @_fused_kernel(%arg0: i32, %arg1: memref<8x64xf32, #tpu.memory_space<vmem>>, %arg2: memref<64x32xf32, #tpu.memory_space<vmem>>, %arg3: memref<1x32xf32, #tpu.memory_space<vmem>>, %arg4: memref<8x32xf32, #tpu.memory_space<vmem>>, %arg5: memref<1x32xf32, #tpu.memory_space<vmem>>, %arg6: memref<1x32xf32, #tpu.memory_space<vmem>>, %arg7: memref<8x32xf32, #tpu.memory_space<vmem>>) attributes {dimension_semantics = [#tpu.dimension_semantics<parallel>], iteration_bounds = array<i64: 2>, scalar_prefetch = 0 : i64, scratch_operands = 0 : i64, tpu.core_type = #tpu.core_type<tc>, window_params = [{transform_indices = @transform_0, window_bounds = array<i64: 8, 64>}, {pipeline_mode = #tpu.pipeline_mode<synchronous>, transform_indices = @transform_1, window_bounds = array<i64: 64, 32>}, {pipeline_mode = #tpu.pipeline_mode<synchronous>, transform_indices = @transform_2, window_bounds = array<i64: 1, 32>}, {transform_indices = @transform_3, window_bounds = array<i64: 8, 32>}, {pipeline_mode = #tpu.pipeline_mode<synchronous>, transform_indices = @transform_4, window_bounds = array<i64: 1, 32>}, {pipeline_mode = #tpu.pipeline_mode<synchronous>, transform_indices = @transform_5, window_bounds = array<i64: 1, 32>}, {transform_indices = @transform_6, window_bounds = array<i64: 8, 32>}]} {
    %c0 = arith.constant 0 : index
    %c0_0 = arith.constant 0 : index
    %0 = vector.load %arg1[%c0, %c0_0] : memref<8x64xf32, #tpu.memory_space<vmem>>, vector<8x64xf32>
    %c0_1 = arith.constant 0 : index
    %c0_2 = arith.constant 0 : index
    %1 = vector.load %arg2[%c0_1, %c0_2] : memref<64x32xf32, #tpu.memory_space<vmem>>, vector<64x32xf32>
    %cst = arith.constant dense<0.000000e+00> : vector<8x32xf32>
    %2 = tpu.matmul %0, %1, %cst {dimension_numbers = #tpu.dot_dimension_numbers<[1], [0], [0], [1], [0, 0, 1, 1], [], []>} : vector<8x64xf32>, vector<64x32xf32>, vector<8x32xf32> -> vector<8x32xf32>
    %c0_3 = arith.constant 0 : index
    %c0_4 = arith.constant 0 : index
    %3 = vector.load %arg3[%c0_3, %c0_4] : memref<1x32xf32, #tpu.memory_space<vmem>>, vector<1x32xf32>
    %4 = vector.broadcast %3 : vector<1x32xf32> to vector<8x32xf32>
    %5 = arith.addf %2, %4 : vector<8x32xf32>
    %c0_5 = arith.constant 0 : index
    %c0_6 = arith.constant 0 : index
    %6 = vector.load %arg4[%c0_5, %c0_6] : memref<8x32xf32, #tpu.memory_space<vmem>>, vector<8x32xf32>
    %7 = arith.addf %5, %6 : vector<8x32xf32>
    %cst_7 = arith.constant dense<0.000000e+00> : vector<8xf32>
    %8 = vector.multi_reduction <add>, %7, %cst_7 [1] : vector<8x32xf32> to vector<8xf32>
    %9 = vector.shape_cast %8 : vector<8xf32> to vector<8x1xf32>
    %10 = arith.mulf %7, %7 : vector<8x32xf32>
    %cst_8 = arith.constant dense<0.000000e+00> : vector<8xf32>
    %11 = vector.multi_reduction <add>, %10, %cst_8 [1] : vector<8x32xf32> to vector<8xf32>
    %12 = vector.shape_cast %11 : vector<8xf32> to vector<8x1xf32>
    %cst_9 = arith.constant 3.125000e-02 : f32
    %13 = vector.broadcast %cst_9 : f32 to vector<8x1xf32>
    %14 = arith.mulf %9, %13 : vector<8x1xf32>
    %cst_10 = arith.constant 3.125000e-02 : f32
    %15 = vector.broadcast %cst_10 : f32 to vector<8x1xf32>
    %16 = arith.mulf %12, %15 : vector<8x1xf32>
    %17 = arith.mulf %14, %14 : vector<8x1xf32>
    %18 = arith.subf %16, %17 : vector<8x1xf32>
    %cst_11 = arith.constant 0.000000e+00 : f32
    %19 = vector.broadcast %cst_11 : f32 to vector<8x1xf32>
    %20 = arith.maximumf %18, %19 : vector<8x1xf32>
    %cst_12 = arith.constant 1.000000e-10 : f32
    %21 = vector.broadcast %cst_12 : f32 to vector<8x1xf32>
    %22 = arith.addf %20, %21 : vector<8x1xf32>
    %23 = math.rsqrt %22 : vector<8x1xf32>
    %24 = vector.broadcast %14 : vector<8x1xf32> to vector<8x32xf32>
    %25 = arith.subf %7, %24 : vector<8x32xf32>
    %26 = vector.broadcast %23 : vector<8x1xf32> to vector<8x32xf32>
    %27 = arith.mulf %25, %26 : vector<8x32xf32>
    %c0_13 = arith.constant 0 : index
    %c0_14 = arith.constant 0 : index
    %28 = vector.load %arg5[%c0_13, %c0_14] : memref<1x32xf32, #tpu.memory_space<vmem>>, vector<1x32xf32>
    %29 = vector.broadcast %28 : vector<1x32xf32> to vector<8x32xf32>
    %30 = arith.mulf %27, %29 : vector<8x32xf32>
    %c0_15 = arith.constant 0 : index
    %c0_16 = arith.constant 0 : index
    %31 = vector.load %arg6[%c0_15, %c0_16] : memref<1x32xf32, #tpu.memory_space<vmem>>, vector<1x32xf32>
    %32 = vector.broadcast %31 : vector<1x32xf32> to vector<8x32xf32>
    %33 = arith.addf %30, %32 : vector<8x32xf32>
    %c0_17 = arith.constant 0 : index
    %c0_18 = arith.constant 0 : index
    %34 = vector.load %arg7[%c0_17, %c0_18] : memref<8x32xf32, #tpu.memory_space<vmem>>, vector<8x32xf32>
    tpu.vector_store %arg7[%c0_17, %c0_18], %33 {strides = array<i32>} : memref<8x32xf32, #tpu.memory_space<vmem>>, vector<8x32xf32>,
    return
  }
  func.func @transform_0(%arg0: i32) -> (i32, i32) {
    %c0_i32 = arith.constant 0 : i32
    %c0_i32_0 = arith.constant 0 : i32
    return %arg0, %c0_i32 : i32, i32
  }
  func.func @transform_1(%arg0: i32) -> (i32, i32) {
    %c0_i32 = arith.constant 0 : i32
    %c0_i32_0 = arith.constant 0 : i32
    %c0_i32_1 = arith.constant 0 : i32
    return %c0_i32, %c0_i32_0 : i32, i32
  }
  func.func @transform_2(%arg0: i32) -> (i32, i32) {
    %c0_i32 = arith.constant 0 : i32
    %c0_i32_0 = arith.constant 0 : i32
    %c0_i32_1 = arith.constant 0 : i32
    return %c0_i32, %c0_i32_0 : i32, i32
  }
  func.func @transform_3(%arg0: i32) -> (i32, i32) {
    %c0_i32 = arith.constant 0 : i32
    %c0_i32_0 = arith.constant 0 : i32
    return %arg0, %c0_i32 : i32, i32
  }
  func.func @transform_4(%arg0: i32) -> (i32, i32) {
    %c0_i32 = arith.constant 0 : i32
    %c0_i32_0 = arith.constant 0 : i32
    %c0_i32_1 = arith.constant 0 : i32
    return %c0_i32, %c0_i32_0 : i32, i32
  }
  func.func @transform_5(%arg0: i32) -> (i32, i32) {
    %c0_i32 = arith.constant 0 : i32
    %c0_i32_0 = arith.constant 0 : i32
    %c0_i32_1 = arith.constant 0 : i32
    return %c0_i32, %c0_i32_0 : i32, i32
  }
  func.func @transform_6(%arg0: i32) -> (i32, i32) {
    %c0_i32 = arith.constant 0 : i32
    %c0_i32_0 = arith.constant 0 : i32
    return %arg0, %c0_i32 : i32, i32
  }
}

</mosaic_0001>

<bundles_post_ra>
// kernel: tpu_custom_call.1
= control target key start
LH: loop header
LB: loop body
LE: loop exit
PB: predicated region body
PF: predicated region fallthrough
CT: control target
= control target key end

     0   :  { %11 = vsyncpa [#allocation3], 0  ;;  %s816_s0 = inlined_call_operand.vmem [shape: f32[16,64], index: 0, kind: input, shape index: {}]   ;;  %s817_s1 = inlined_call_operand.vmem [shape: f32[64,32], index: 1, kind: input, shape index: {}]   ;;  %s818_s2 = inlined_call_operand.vmem [shape: f32[1,32], index: 2, kind: input, shape index: {}]   ;;  %s819_s3 = inlined_call_operand.vmem [shape: f32[16,32], index: 3, kind: input, shape index: {}]   ;;  %s820_s4 = inlined_call_operand.vmem [shape: f32[1,32], index: 4, kind: input, shape index: {}]   ;;  %s821_s5 = inlined_call_operand.vmem [shape: f32[1,32], index: 5, kind: input, shape index: {}]   ;;  %s822_s6 = inlined_call_operand.hbm [shape: f32[16,32], index: 6, kind: output, shape index: {}]  }
   0x1   :  { %13 = vsyncpa [#allocation3 + $0x1], 0  ;;  %s677_s21 = smov 0   ;;  %s679_s22 = smov 0  }
   0x2   :  { %s681_s23 = smov 0   ;;  %s683_s24 = smov 0  }
   0x3 LB: > { %s698_s25 = sadd.s32 4294967295, %s636_s24   ;;  %s475_s26 = sadd.s32 4294967294, %s636_s24   ;;  %s636_s24 = sphi %s683_s24, %s828_s24   ;;  %s632_s23 = sphi %s681_s23, %s827_s23   ;;  %s628_s22 = sphi %s679_s22, %s826_s22   ;;  %s624_s21 = sphi %s677_s21, %s825_s21  }
   0x4   : > { %s702_s27 = sadd.s32 1, %s636_s24   ;;  %s162_s28 = sadd.s32 1, %s632_s23 }
   0x5   : > { %s159_s29 = ssub.s32 %s636_s24, %s702_s27  ;;  %p172_p0 = scmp.ne.s32.totalorder %s632_s23, %s628_s22 }
   0x6   : > { %p160_p1 = scmp.eq.s32.totalorder %s159_s29, 0  ;;  %p173_p2 = scmp.eq.s32.totalorder %s698_s25, 1 }
   0x7   : > { %p178_p3 = scmp.ne.s32.totalorder %s628_s22, %s624_s21  ;;  %p179_p4 = scmp.eq.s32.totalorder %s475_s26, 1 }
   0x8   : > { %s713_s30 = scalar_select %p160_p1, %s632_s23, %s162_s28  }
   0x9   : > { %p715_p5 = por %p173_p2, %p172_p0  ;;  %p719_p6 = por %p179_p4, %p178_p3 }
   0xa   : > { %p478_p7 = scmp.ge.s32.totalorder %s636_s24, 1  ;;  %p223_p8 = scmp.lt.s32.totalorder %s636_s24, 3 }
   0xc   : > { %p224_p9 = pnand %p478_p7, %p223_p8 }
   0xd   : > { %v265_v0 = vld [vmem:[%s817_s1] sm:$0xff] (!%p224_p9)  ;;  %v266_v1 = vld [vmem:[%s817_s1 + $0x8] sm:$0xff] (!%p224_p9)  ;;  %v267_v2 = vld [vmem:[%s817_s1 + $0x10] sm:$0xff] (!%p224_p9)  ;;  %v638_v3 = vmov (!%p224_p9), 0.0|0.0   ;;  %vm639_vm0 = vmmov (!%p224_p9), 0   ;;  %v640_v6 = vmov (!%p224_p9), 0.0  }
   0xe   : > { %227 = sbr.rel (%p224_p9) target bundleno = 433 (0x1b1), region = 44  ;;  %518 = vmatprep.subr.bf16.mxu0 (!%p224_p9), %v638_v3  ;;  %v519_v4 = vpack.c.bf16 (!%p224_p9), %v266_v1, %v265_v0  ;;  %v268_v5 = vld [vmem:[%s817_s1 + $0x18] sm:$0xff] (!%p224_p9)  ;;  %515 = vmatprep.mubr.msk.f32.mxu0 (!%p224_p9), %vm639_vm0, %v640_v6  ;;  %p256_p10 = scmp.lt.s32.totalorder (!%p224_p9), %s698_s25, 1  ;;  %v269_v8 = vld [vmem:[%s817_s1 + $0x20] sm:$0xff] (!%p224_p9)  ;;  %v270_v9 = vld [vmem:[%s817_s1 + $0x28] sm:$0xff] (!%p224_p9)  ;;  %vm280_vm1 = vcmask (!%p224_p9), 523264  }
   0xf   : > { %v522_v7 = vpack.c.bf16 (!%p224_p9), %v268_v5, %v267_v2  ;;  %v525_v10 = vpack.c.bf16 (!%p224_p9), %v270_v9, %v269_v8  ;;  %v271_v11 = vld [vmem:[%s817_s1 + $0x30] sm:$0xff] (!%p224_p9)  ;;  %v272_v12 = vld [vmem:[%s817_s1 + $0x38] sm:$0xff] (!%p224_p9)  ;;  %v482_v15 = vld [vmem:[%s818_s2] ss:$0 sm:$0xff] (!%p224_p9)  ;;  %vm356_vm2 = vcmask (!%p224_p9), 261120   ;;  %s253_s20 = sand.u32 (!%p224_p9), 1, %s628_s22  }
  0x10   : > { %520 = vmatpush3.bf16.msra.mxu0 (!%p224_p9), %v519_v4  ;;  %v528_v13 = vpack.c.bf16 (!%p224_p9), %v272_v12, %v271_v11  ;;  %v484_v34 = vld [vmem:[%s820_s4] ss:$0 sm:$0xff] (!%p224_p9) }
  0x11   : > { %521 = vmatprep.subr.bf16.mxu0 (!%p224_p9), %v638_v3  ;;  %v485_v36 = vld [vmem:[%s821_s5] ss:$0 sm:$0xff] (!%p224_p9) }
  0x14   : > { %523 = vmatpush3.bf16.msra.mxu0 (!%p224_p9), %v522_v7 }
  0x15   : > { %s257_s26 = scalar_select %p256_p10, %s698_s25, 1  ;;  %524 = vmatprep.subr.bf16.mxu0 %v638_v3 }
  0x17   : > { %s480_s11 = sshll.u32 %s257_s26, 3  ;;  %s479_s26 = sshll.u32 %s253_s20, 3 }
  0x18   : > { %526 = vmatpush3.bf16.msra.mxu0 %v525_v10  ;;  %s259_s14 = scalar_lea.vmem %s816_s0, %s480_s11  ;;  %s263_s17 = scalar_lea.vmem %s819_s3, %s480_s11 }
  0x19   : > { %527 = vmatprep.subr.bf16.mxu0 %v638_v3  ;;  %v264_v14 = vld [vmem:[%s259_s14] sm:$0xff]  ;;  %s487_s11 = sshll.u32 %s698_s25, 7  ;;  %s255_s12 = scalar_lea.vmem [#allocation2], %s479_s26 }
  0x1a   : > { %v354_v17 = vld [vmem:[%s263_s17] sm:$0xff]  ;;  %s404_s13 = sshll.u32 %s255_s12, 4  ;;  %s773_s16 = scalar_lea.hbm %s822_s6, %s487_s11  ;;  %s775_s13 = int_to_ptr.vmem [resolvable:$true] %s404_s13 }
  0x1b   : > { %s391_s17 = scalar_lea.sflag [#allocation3], %s253_s20  ;;  %s574_s18 = scalar_lea.vmem %s775_s13, 128 }
  0x1c   : > { %529 = vmatpush3.bf16.msra.mxu0 %v528_v13  ;;  %p575_p11 = scmp.ne.s32.totalorder %s775_s13, %s574_s18  ;;  %s641_s25 = smov [#allocation2]  }
  0x1d   : > { %s578_s19 = sshll.u32 %s641_s25, 4  ;;  %s579_s19 = int_to_ptr.vmem [resolvable:$false] %s578_s19 }
  0x1e   : > { %p576_p12 = pnand %p575_p11, %p715_p5  ;;  %s580_s26 = scalar_lea.vmem %s579_s19, 256 }
  0x1f   : > { %516 = vmatmul.mubr.msk.f32.vlgmr.msra.gmra.mrb[0].mxu0 %vm280_vm1, %v264_v14  ;;  %p581_p0 = scmp.lt.s32.totalorder %s775_s13, %s579_s19  ;;  %p582_p1 = scmp.lt.s32.totalorder %s580_s26, %s574_s18 }
  0x20   : > { %p577_p13 = pneg %p576_p12 }
  0x21   : > { %p583_p2 = por %p582_p1, %p581_p0 }
  0x23   : > { %p584_p3 = pnand %p583_p2, %p577_p13 }
  0xf2   : > { %v350_v16 = vpop.f32.mrb[0].mxu0 }
  0xf3   : > { %v351_v18 = vadd.f32 %v482_v15, %v350_v16  ;;  %v517_v19 = vpop.f32.mrb[1].mxu0 }
  0xf5   : > { %v355_v20 = vadd.f32 %v354_v17, %v351_v18 }
  0xf7   : > { %v357_v21 = vsel %vm356_vm2, %v355_v20, 0.0  ;;  %v360_v22 = vmul.f32 %v355_v20, %v355_v20 }
  0xf8   : > { %358 = vadd.xlane.f32.xlu0 %v357_v21 }
  0xf9   : > { %v361_v23 = vsel %vm356_vm2, %v360_v22, 0.0 }
  0xfc   : > { %362 = vadd.xlane.f32.xlu0 %v361_v23 }
 0x185   : > { %v359_v24 = vpop.xlane.xlu0 %358 }
 0x186   : > { %v364_v25 = vmul.f32 0.03125, %v359_v24 }
 0x188   : > { %v366_v27 = vmul.f32 %v364_v25, %v364_v25  ;;  %v371_v32 = vsub.f32 %v355_v20, %v364_v25 }
 0x189   : > { %v363_v26 = vpop.xlane.xlu0 %362 }
 0x18a   : > { %v365_v28 = vmul.f32 0.03125, %v363_v26 }
 0x18c   : > { %v367_v29 = vsub.f32 %v365_v28, %v366_v27 }
 0x18e   : > { %v368_v30 = vmax.f32 %v367_v29, 0.0 }
 0x190   : > { %v369_v31 = vadd.f32 1e-10, %v368_v30 }
 0x192   : > { %572 = vrsqrt.f32 %v369_v31 }
 0x19c   : > { %v573_v33 = vpop.eup %572 }
 0x19d   : > { %v372_v35 = vmul.f32 %v573_v33, %v371_v32 }
 0x19f   : > { %v380_v37 = vmul.f32 %v484_v34, %v372_v35 }
 0x1a1   : > { %v388_v38 = vadd.f32 %v485_v36, %v380_v37 }
 0x1a3   : > { %389 = vst.msk [vmem:[%s255_s12] sm:$0xff] %vm356_vm2, %v388_v38 }
 0x1a4   : > { %587 = shalt.err (!%p584_p3)
}
 0x1a5   : > { %s588_s20 = scalar_lea.hbm %s773_s16, 128  ;;  %s592_s9 = scalar_lea.hbm %s822_s6, 256 }
 0x1a6   : > { %p589_p4 = scmp.ne.s32.totalorder %s773_s16, %s588_s20  ;;  %p593_p9 = scmp.lt.u32.totalorder %s773_s16, %s822_s6 }
 0x1a7   : > { %p594_p10 = scmp.lt.u32.totalorder %s592_s9, %s588_s20  ;;  %p596_p12 = scmp.lt.u32.totalorder %s588_s20, %s773_s16 }
 0x1a8   : > { %p590_p7 = pnand %p589_p4, %p715_p5 }
 0x1a9   : > { %p595_p11 = por %p594_p10, %p593_p9 }
 0x1aa   : > { %p591_p8 = pneg %p590_p7 }
 0x1ab   : > { %p597_p13 = por %p596_p12, %p595_p11 }
 0x1ad   : > { %p598_p0 = pnand %p597_p13, %p591_p8 }
 0x1af   : > { %601 = shalt.err (!%p598_p0)
}
 0x1b0   : > { %530 = dma.vmem_to_hbm [thread:$0]  (%p715_p5), %s775_s13, 128, %s773_s16, %s391_s17  }
 0x1b1 PF: > { %p536_p1 = scmp.ge.s32.totalorder %s636_s24, 2  ;;  %s416_s12 = sand.u32 1, %s624_s21  }
 0x1b2   : > { %s417_s14 = scalar_lea.sflag [#allocation3], %s416_s12 }
 0x1b3   : > { %p533_p2 = pnand %p536_p1, %p719_p6 }
 0x1b5   : > { %619 = dma.done.wait (!%p533_p2), %s417_s14, 128  }
 0x1b6   : > { %621 = vsyncadd (!%p533_p2), %s417_s14, 4294967168  ;;  %p16_p3 = scmp.ge.s32.totalorder %s702_s27, 4   ;;  %s825_s21 = smov %s628_s22 }
 0x1b7   : > { %s826_s22 = smov %s632_s23  ;;  %s827_s23 = smov %s713_s30 }
 0x1b8   : > { %s828_s24 = smov %s702_s27  ;;  %18 = sbr.rel (!%p16_p3) target bundleno = 3 (0x3), region = 82 }
 0x1bf   :  { %422 = vsyncpa [#allocation3], 1 }
 0x1c0   :  { %424 = vsyncpa [#allocation3 + $0x1], 1 }

</bundles_post_ra>
